<compile_context>
chip_gen: v7x
topology: tpu7x:2x2x1
jax: 0.10.0
libtpu: 0.0.40
codegen_flags: <defaults>
</compile_context>

<pallas_src>
import jax
import jax.numpy as jnp
from jax import lax
from jax.experimental import pallas as pl
from jax.experimental.pallas import tpu as pltpu

EMB_DIM = 64          # embedding_dim
IN_DIM = 2 * EMB_DIM  # 128 after concat
H1 = 128
H2 = 64
OUT = 1


def ncf_mlp_kernel(u_ref, it_ref, w1_ref, b1_ref, w2_ref, b2_ref,
                   w3_ref, b3_ref, o_ref, x_scr):
    # u_ref/it_ref: (tb, 64) bf16 tiles of gathered user/item embeddings.
    # VMEM-side concat into a (tb, 128) bf16 scratch (no HBM round-trip).
    x_scr[:, :EMB_DIM] = u_ref[...]
    x_scr[:, EMB_DIM:] = it_ref[...]

    # Layer 1: single K=128 matmul (tb,128) @ (128,128), bf16 in, f32 acc.
    h1 = jnp.dot(x_scr[...], w1_ref[...], preferred_element_type=jnp.float32)
    h1 = jnp.maximum(h1 + b1_ref[...], 0.0)                      # f32 bias/ReLU

    # Layer 2: (tb,128) @ (128,64), bf16 in, f32 acc.
    h2 = jnp.dot(h1.astype(jnp.bfloat16), w2_ref[...],
                 preferred_element_type=jnp.float32)
    h2 = jnp.maximum(h2 + b2_ref[...], 0.0)                      # (tb, 64) f32

    # Layer 3 (64 -> 1) as an NT matmul so the result is lane-dense:
    # (1,64) x (tb,64)^T -> (1,tb). bf16 operands avoid an f32 h2 transpose.
    logits = lax.dot_general(w3_ref[...], h2.astype(jnp.bfloat16),
                             dimension_numbers=(((1,), (1,)), ((), ())),
                             preferred_element_type=jnp.float32)
    o_ref[...] = logits + b3_ref[0]                              # (1, tb), dense store


def ncf_mlp(u, it, w1, b1, w2, b2, w3, b3, *, tb=2048):
    """u, it: (B, 64) bf16 gathered embeddings. Returns (B, 1) f32 logits."""
    B = u.shape[0]
    B_pad128 = ((B + 127) // 128) * 128

    # Lane/MXU-aligned batch tile. Cap at 4096 so the double-buffered inputs +
    # f32 intermediates stay well inside v5e's 16 MiB scoped-VMEM default.
    tb = max(128, (min(int(tb), 4096) // 128) * 128)
    tb = min(tb, B_pad128)
    # Guarantee >= 2 grid steps when the padded batch allows it, so the
    # "parallel" axis shards across both TensorCores on v7x.
    if B_pad128 >= 256:
        tb = min(tb, max(128, ((B_pad128 // 2) // 128) * 128))

    B_pad = ((B + tb - 1) // tb) * tb
    if B_pad != B:
        pad = ((0, B_pad - B), (0, 0))
        u = jnp.pad(u, pad)
        it = jnp.pad(it, pad)

    # bf16 MXU operands (no-ops if params are already stored in bf16);
    # biases stay f32, final-layer weight row goes bf16 for the NT dot.
    u_b = u.astype(jnp.bfloat16)
    it_b = it.astype(jnp.bfloat16)
    w1b = w1.astype(jnp.bfloat16)                   # (128, 128)
    w2b = w2.astype(jnp.bfloat16)                   # (128, 64)
    b1r = b1.reshape(1, H1).astype(jnp.float32)
    b2r = b2.reshape(1, H2).astype(jnp.float32)
    w3r = w3.reshape(1, H2).astype(jnp.bfloat16)    # (64,1) -> (1,64) row
    b3r = b3.reshape(1).astype(jnp.float32)         # scalar in SMEM

    grid = (B_pad // tb,)
    full = lambda i: (0, 0)
    # NOTE: if profiling shows exposed DMA on the u/it streams at large tb,
    # bump their BlockSpecs to pipeline_mode=pl.Buffered(3); weights/biases use
    # constant block indices so they are not re-DMA'd per step.
    out2d = pl.pallas_call(
        ncf_mlp_kernel,
        out_shape=jax.ShapeDtypeStruct((1, B_pad), jnp.float32),
        grid=grid,
        in_specs=[
            pl.BlockSpec((tb, EMB_DIM), lambda i: (i, 0)),       # u tile
            pl.BlockSpec((tb, EMB_DIM), lambda i: (i, 0)),       # it tile
            pl.BlockSpec((IN_DIM, H1), full),                    # W1 (128,128)
            pl.BlockSpec((1, H1), full),                         # b1
            pl.BlockSpec((H1, H2), full),                        # W2
            pl.BlockSpec((1, H2), full),                         # b2
            pl.BlockSpec((1, H2), full),                         # w3 row
            pl.BlockSpec(memory_space=pltpu.MemorySpace.SMEM),   # b3 scalar
        ],
        out_specs=pl.BlockSpec((1, tb), lambda i: (0, i)),       # lane-dense slab
        scratch_shapes=[pltpu.VMEM((tb, IN_DIM), jnp.bfloat16)], # concat scratch
        compiler_params=pltpu.CompilerParams(
            dimension_semantics=("parallel",),
            vmem_limit_bytes=32 << 20),
    )(u_b, it_b, w1b, b1r, w2b, b2r, w3r, b3r)

    return out2d.reshape(-1)[:B].reshape(B, 1)


def ncf_forward(user_ids, item_ids, params):
    # Embedding row gather stays in plain JAX (XLA gather). Tables are stored
    # in bf16, so the gather writes bf16 rows directly (no separate cast pass).
    # TODO(synk): if this path ever needs the gather fused into the kernel,
    # prefetch ids via PrefetchScalarGridSpec and batch many rows per DMA; do
    # NOT issue per-row 128 B DMAs (descriptor-overhead-bound).
    # TODO(synk): optional v7x-only path: fp8 embedding tables for the MXU
    # operands (f32 accumulate) once accuracy is validated.
    u = jnp.take(params["user_emb"], user_ids, axis=0)    # (B, 64) bf16
    it = jnp.take(params["item_emb"], item_ids, axis=0)   # (B, 64) bf16
    return ncf_mlp(u, it, params["w1"], params["b1"],
                   params["w2"], params["b2"],
                   params["w3"], params["b3"])


def init_params(key, num_users, num_items):
    ks = jax.random.split(key, 8)
    scale = 0.05
    return {
        # Tables and big matmul weights stored in bf16 (MXU operand dtype).
        "user_emb": jax.random.normal(ks[0], (num_users, EMB_DIM),
                                      jnp.float32).astype(jnp.bfloat16),
        "item_emb": jax.random.normal(ks[1], (num_items, EMB_DIM),
                                      jnp.float32).astype(jnp.bfloat16),
        "w1": (scale * jax.random.normal(ks[2], (IN_DIM, H1),
                                         jnp.float32)).astype(jnp.bfloat16),
        "b1": scale * jax.random.normal(ks[3], (1, H1), jnp.float32),
        "w2": (scale * jax.random.normal(ks[4], (H1, H2),
                                         jnp.float32)).astype(jnp.bfloat16),
        "b2": scale * jax.random.normal(ks[5], (1, H2), jnp.float32),
        "w3": scale * jax.random.normal(ks[6], (H2, OUT), jnp.float32),
        "b3": scale * jax.random.normal(ks[7], (1, OUT), jnp.float32),
    }


def ncf_reference(user_ids, item_ids, params):
    # Pure f32 reference (matches the PyTorch module's math; bf16 params are
    # upcast so the only remaining delta is the kernel's bf16 MXU operands).
    u = jnp.take(params["user_emb"].astype(jnp.float32), user_ids, axis=0)
    it = jnp.take(params["item_emb"].astype(jnp.float32), item_ids, axis=0)
    x = jnp.concatenate([u, it], axis=-1)
    h1 = jnp.maximum(x @ params["w1"].astype(jnp.float32) + params["b1"], 0.0)
    h2 = jnp.maximum(h1 @ params["w2"].astype(jnp.float32) + params["b2"], 0.0)
    return h2 @ params["w3"] + params["b3"]


if __name__ == "__main__":
    num_users, num_items, batch = 100, 200, 8
    key = jax.random.PRNGKey(0)
    kp, ku, ki = jax.random.split(key, 3)
    params = init_params(kp, num_users, num_items)
    user_ids = jax.random.randint(ku, (batch,), 0, num_users, dtype=jnp.int32)
    item_ids = jax.random.randint(ki, (batch,), 0, num_items, dtype=jnp.int32)

    fwd = jax.jit(ncf_forward)
    out = jax.block_until_ready(fwd(user_ids, item_ids, params))
    ref = ncf_reference(user_ids, item_ids, params)
    assert out.shape == (batch, 1), out.shape
    max_err = float(jnp.max(jnp.abs(out - ref)))
    # bf16 MXU operands (f32 accumulation) vs f32 reference: ~1e-3 expected.
    assert max_err < 2e-2, f"max abs err {max_err}"
    print("KERNEL_OK")
</pallas_src>

<mosaic_0001>
module attributes {stable_mosaic.version = 11 : i64} {
  func.func @ncf_mlp_kernel(%arg0: i32, %arg1: memref<128x64xbf16, #tpu.memory_space<vmem>>, %arg2: memref<128x64xbf16, #tpu.memory_space<vmem>>, %arg3: memref<128x128xbf16, #tpu.memory_space<vmem>>, %arg4: memref<1x128xf32, #tpu.memory_space<vmem>>, %arg5: memref<128x64xbf16, #tpu.memory_space<vmem>>, %arg6: memref<1x64xf32, #tpu.memory_space<vmem>>, %arg7: memref<1x64xbf16, #tpu.memory_space<vmem>>, %arg8: memref<1xf32, #tpu.memory_space<smem>>, %arg9: memref<1x128xf32, #tpu.memory_space<vmem>>, %arg10: memref<128x128xbf16, #tpu.memory_space<vmem>>) attributes {dimension_semantics = [#tpu.dimension_semantics<parallel>], iteration_bounds = array<i64: 1>, scalar_prefetch = 0 : i64, scratch_operands = 1 : i64, tpu.core_type = #tpu.core_type<tc>, window_params = [{transform_indices = @transform_0, window_bounds = array<i64: 128, 64>}, {transform_indices = @transform_1, window_bounds = array<i64: 128, 64>}, {pipeline_mode = #tpu.pipeline_mode<synchronous>, transform_indices = @transform_2, window_bounds = array<i64: 128, 128>}, {pipeline_mode = #tpu.pipeline_mode<synchronous>, transform_indices = @transform_3, window_bounds = array<i64: 1, 128>}, {pipeline_mode = #tpu.pipeline_mode<synchronous>, transform_indices = @transform_4, window_bounds = array<i64: 128, 64>}, {pipeline_mode = #tpu.pipeline_mode<synchronous>, transform_indices = @transform_5, window_bounds = array<i64: 1, 64>}, {pipeline_mode = #tpu.pipeline_mode<synchronous>, transform_indices = @transform_6, window_bounds = array<i64: 1, 64>}, {transform_indices = @transform_7, window_bounds = array<i64: 1>}, {transform_indices = @transform_8, window_bounds = array<i64: 1, 128>}]} {
    %c0 = arith.constant 0 : index
    %c0_0 = arith.constant 0 : index
    %0 = vector.load %arg1[%c0, %c0_0] : memref<128x64xbf16, #tpu.memory_space<vmem>>, vector<128x64xbf16>
    %c0_1 = arith.constant 0 : index
    %c0_2 = arith.constant 0 : index
    %1 = vector.load %arg10[%c0_1, %c0_2] : memref<128x128xbf16, #tpu.memory_space<vmem>>, vector<128x64xbf16>
    tpu.vector_store %arg10[%c0_1, %c0_2], %0 {strides = array<i32>} : memref<128x128xbf16, #tpu.memory_space<vmem>>, vector<128x64xbf16>,
    %c0_3 = arith.constant 0 : index
    %c0_4 = arith.constant 0 : index
    %2 = vector.load %arg2[%c0_3, %c0_4] : memref<128x64xbf16, #tpu.memory_space<vmem>>, vector<128x64xbf16>
    %c0_5 = arith.constant 0 : index
    %c64 = arith.constant 64 : index
    %3 = vector.load %arg10[%c0_5, %c64] : memref<128x128xbf16, #tpu.memory_space<vmem>>, vector<128x64xbf16>
    tpu.vector_store %arg10[%c0_5, %c64], %2 {strides = array<i32>} : memref<128x128xbf16, #tpu.memory_space<vmem>>, vector<128x64xbf16>,
    %c0_6 = arith.constant 0 : index
    %c0_7 = arith.constant 0 : index
    %4 = vector.load %arg10[%c0_6, %c0_7] : memref<128x128xbf16, #tpu.memory_space<vmem>>, vector<128x128xbf16>
    %c0_8 = arith.constant 0 : index
    %c0_9 = arith.constant 0 : index
    %5 = vector.load %arg3[%c0_8, %c0_9] : memref<128x128xbf16, #tpu.memory_space<vmem>>, vector<128x128xbf16>
    %cst = arith.constant dense<0.000000e+00> : vector<128x128xf32>
    %6 = tpu.matmul %4, %5, %cst {dimension_numbers = #tpu.dot_dimension_numbers<[1], [0], [0], [1], [0, 0, 1, 1], [], []>} : vector<128x128xbf16>, vector<128x128xbf16>, vector<128x128xf32> -> vector<128x128xf32>
    %c0_10 = arith.constant 0 : index
    %c0_11 = arith.constant 0 : index
    %7 = vector.load %arg4[%c0_10, %c0_11] : memref<1x128xf32, #tpu.memory_space<vmem>>, vector<1x128xf32>
    %8 = vector.broadcast %7 : vector<1x128xf32> to vector<128x128xf32>
    %9 = arith.addf %6, %8 : vector<128x128xf32>
    %cst_12 = arith.constant 0.000000e+00 : f32
    %10 = vector.broadcast %cst_12 : f32 to vector<128x128xf32>
    %11 = arith.maximumf %9, %10 : vector<128x128xf32>
    %12 = arith.truncf %11 : vector<128x128xf32> to vector<128x128xbf16>
    %c0_13 = arith.constant 0 : index
    %c0_14 = arith.constant 0 : index
    %13 = vector.load %arg5[%c0_13, %c0_14] : memref<128x64xbf16, #tpu.memory_space<vmem>>, vector<128x64xbf16>
    %cst_15 = arith.constant dense<0.000000e+00> : vector<128x64xf32>
    %14 = tpu.matmul %12, %13, %cst_15 {dimension_numbers = #tpu.dot_dimension_numbers<[1], [0], [0], [1], [0, 0, 1, 1], [], []>} : vector<128x128xbf16>, vector<128x64xbf16>, vector<128x64xf32> -> vector<128x64xf32>
    %c0_16 = arith.constant 0 : index
    %c0_17 = arith.constant 0 : index
    %15 = vector.load %arg6[%c0_16, %c0_17] : memref<1x64xf32, #tpu.memory_space<vmem>>, vector<1x64xf32>
    %16 = vector.broadcast %15 : vector<1x64xf32> to vector<128x64xf32>
    %17 = arith.addf %14, %16 : vector<128x64xf32>
    %cst_18 = arith.constant 0.000000e+00 : f32
    %18 = vector.broadcast %cst_18 : f32 to vector<128x64xf32>
    %19 = arith.maximumf %17, %18 : vector<128x64xf32>
    %c0_19 = arith.constant 0 : index
    %c0_20 = arith.constant 0 : index
    %20 = vector.load %arg7[%c0_19, %c0_20] : memref<1x64xbf16, #tpu.memory_space<vmem>>, vector<1x64xbf16>
    %21 = arith.truncf %19 : vector<128x64xf32> to vector<128x64xbf16>
    %cst_21 = arith.constant dense<0.000000e+00> : vector<1x128xf32>
    %22 = tpu.matmul %20, %21, %cst_21 {dimension_numbers = #tpu.dot_dimension_numbers<[1], [1], [0], [0], [0, 0, 1, 0], [], []>} : vector<1x64xbf16>, vector<128x64xbf16>, vector<1x128xf32> -> vector<1x128xf32>
    %c0_22 = arith.constant 0 : index
    %23 = memref.load %arg8[%c0_22] : memref<1xf32, #tpu.memory_space<smem>>
    %24 = vector.broadcast %23 : f32 to vector<1x128xf32>
    %25 = arith.addf %22, %24 : vector<1x128xf32>
    %c0_23 = arith.constant 0 : index
    %c0_24 = arith.constant 0 : index
    %26 = vector.load %arg9[%c0_23, %c0_24] : memref<1x128xf32, #tpu.memory_space<vmem>>, vector<1x128xf32>
    tpu.vector_store %arg9[%c0_23, %c0_24], %25 {strides = array<i32>} : memref<1x128xf32, #tpu.memory_space<vmem>>, vector<1x128xf32>,
    return
  }
  func.func @transform_0(%arg0: i32) -> (i32, i32) {
    %c0_i32 = arith.constant 0 : i32
    %c0_i32_0 = arith.constant 0 : i32
    return %arg0, %c0_i32 : i32, i32
  }
  func.func @transform_1(%arg0: i32) -> (i32, i32) {
    %c0_i32 = arith.constant 0 : i32
    %c0_i32_0 = arith.constant 0 : i32
    return %arg0, %c0_i32 : i32, i32
  }
  func.func @transform_2(%arg0: i32) -> (i32, i32) {
    %c0_i32 = arith.constant 0 : i32
    %c0_i32_0 = arith.constant 0 : i32
    %c0_i32_1 = arith.constant 0 : i32
    return %c0_i32, %c0_i32_0 : i32, i32
  }
  func.func @transform_3(%arg0: i32) -> (i32, i32) {
    %c0_i32 = arith.constant 0 : i32
    %c0_i32_0 = arith.constant 0 : i32
    %c0_i32_1 = arith.constant 0 : i32
    return %c0_i32, %c0_i32_0 : i32, i32
  }
  func.func @transform_4(%arg0: i32) -> (i32, i32) {
    %c0_i32 = arith.constant 0 : i32
    %c0_i32_0 = arith.constant 0 : i32
    %c0_i32_1 = arith.constant 0 : i32
    return %c0_i32, %c0_i32_0 : i32, i32
  }
  func.func @transform_5(%arg0: i32) -> (i32, i32) {
    %c0_i32 = arith.constant 0 : i32
    %c0_i32_0 = arith.constant 0 : i32
    %c0_i32_1 = arith.constant 0 : i32
    return %c0_i32, %c0_i32_0 : i32, i32
  }
  func.func @transform_6(%arg0: i32) -> (i32, i32) {
    %c0_i32 = arith.constant 0 : i32
    %c0_i32_0 = arith.constant 0 : i32
    %c0_i32_1 = arith.constant 0 : i32
    return %c0_i32, %c0_i32_0 : i32, i32
  }
  func.func @transform_7(%arg0: i32) -> i32 {
    %c0_i32 = arith.constant 0 : i32
    %c0_i32_0 = arith.constant 0 : i32
    return %c0_i32 : i32
  }
  func.func @transform_8(%arg0: i32) -> (i32, i32) {
    %c0_i32 = arith.constant 0 : i32
    %c0_i32_0 = arith.constant 0 : i32
    return %c0_i32, %arg0 : i32, i32
  }
}

</mosaic_0001>

<bundles_post_ra>
// kernel: ncf_forward.1
= control target key start
LH: loop header
LB: loop body
LE: loop exit
PB: predicated region body
PF: predicated region fallthrough
CT: control target
= control target key end

     0   :  { %s855_s9 = smov 64   ;;  %vm95_vm0 = vcmask 523264   ;;  %vm184_vm1 = vcmask 1048064   ;;  %vm857_vm2 = vmmov 0   ;;  %s1048_s1 = inlined_call_operand.vmem [shape: bf16[128,64], index: 1, kind: input, shape index: {}]   ;;  %s1049_s2 = inlined_call_operand.vmem [shape: bf16[128,128], index: 2, kind: input, shape index: {}]   ;;  %s1050_s0 = inlined_call_operand.vmem [shape: bf16[128,64], index: 0, kind: input, shape index: {}]   ;;  %s1051_s4 = inlined_call_operand.vmem [shape: bf16[128,64], index: 4, kind: input, shape index: {}]   ;;  %s1052_s3 = inlined_call_operand.vmem [shape: f32[1,128], index: 3, kind: input, shape index: {}]   ;;  %s1053_s5 = inlined_call_operand.vmem [shape: f32[1,64], index: 5, kind: input, shape index: {}]   ;;  %s1054_s6 = inlined_call_operand.vmem [shape: bf16[1,64], index: 6, kind: input, shape index: {}]   ;;  %s1055_s7 = inlined_call_operand.<no memory space> [shape: f32[1], index: 7, kind: input, shape index: {}]   ;;  %s1056_s8 = inlined_call_operand.vmem [shape: f32[1,128], index: 8, kind: output, shape index: {}]  }
   0x1   :  { %v823_v0 = vld [vmem:[%s1048_s1] sm:$0xff]   ;;  %v824_v1 = vld [vmem:[%s1048_s1 + $0x8] sm:$0xff]   ;;  %v825_v2 = vld [vmem:[%s1048_s1 + $0x10] sm:$0xff]  }
   0x2   :  { %160 = vrot.lane.b32.xlu0 %v823_v0, %s855_s9  ;;  %164 = vrot.lane.b32.xlu1 %v825_v2, %s855_s9  ;;  %v826_v3 = vld [vmem:[%s1048_s1 + $0x18] sm:$0xff]   ;;  %v827_v4 = vld [vmem:[%s1048_s1 + $0x20] sm:$0xff]  }
   0x3   :  { %v828_v5 = vld [vmem:[%s1048_s1 + $0x28] sm:$0xff]   ;;  %v831_v6 = vld [vmem:[%s1049_s2] sm:$0xff]   ;;  %v829_v8 = vld [vmem:[%s1048_s1 + $0x30] sm:$0xff]  }
   0x4   :  { %v832_v7 = vld [vmem:[%s1049_s2 + $0x8] sm:$0xff]   ;;  %736 = vmatprep.subr.bf16.mxu1 %v831_v6  ;;  %v830_v9 = vld [vmem:[%s1048_s1 + $0x38] sm:$0xff]   ;;  %v833_v10 = vld [vmem:[%s1049_s2 + $0x10] sm:$0xff]  }
   0x5   :  { %737 = vmatpush3.bf16.msra.mxu1 %v831_v6  ;;  %v836_v11 = vld [vmem:[%s1050_s0] sm:$0xff]   ;;  %v838_v12 = vld [vmem:[%s1050_s0 + $0x8] sm:$0xff]   ;;  %v834_v13 = vld [vmem:[%s1049_s2 + $0x18] sm:$0xff]  }
   0x6   :  { %162 = vrot.lane.b32.xlu0 %v824_v1, %s855_s9  ;;  %166 = vrot.lane.b32.xlu1 %v826_v3, %s855_s9  ;;  %96 = vst.msk [vmem:[#allocation2] sm:$0xff] %vm95_vm0, %v836_v11  ;;  %97 = vst.msk [vmem:[#allocation2 + $0x8] sm:$0xff] %vm95_vm0, %v838_v12  ;;  %v835_v14 = vld [vmem:[%s1049_s2 + $0x20] sm:$0xff]   ;;  %v841_v15 = vld [vmem:[%s1050_s0 + $0x10] sm:$0xff]  }
   0x7   :  { %738 = vmatprep.subr.bf16.mxu1 %v832_v7  ;;  %v842_v16 = vld [vmem:[%s1050_s0 + $0x18] sm:$0xff]   ;;  %98 = vst.msk [vmem:[#allocation2 + $0x10] sm:$0xff] %vm95_vm0, %v841_v15  ;;  %v843_v17 = vld [vmem:[%s1050_s0 + $0x20] sm:$0xff]   ;;  %v844_v18 = vld [vmem:[%s1050_s0 + $0x28] sm:$0xff]  }
   0x8   :  { %99 = vst.msk [vmem:[#allocation2 + $0x18] sm:$0xff] %vm95_vm0, %v842_v16  ;;  %100 = vst.msk [vmem:[#allocation2 + $0x20] sm:$0xff] %vm95_vm0, %v843_v17  ;;  %v845_v19 = vld [vmem:[%s1050_s0 + $0x30] sm:$0xff]   ;;  %v846_v20 = vld [vmem:[%s1050_s0 + $0x38] sm:$0xff]  }
   0x9   :  { %739 = vmatpush3.bf16.msra.mxu1 %v832_v7  ;;  %101 = vst.msk [vmem:[#allocation2 + $0x28] sm:$0xff] %vm95_vm0, %v844_v18  ;;  %v837_v21 = vld [vmem:[%s1049_s2 + $0x28] sm:$0xff]   ;;  %102 = vst.msk [vmem:[#allocation2 + $0x30] sm:$0xff] %vm95_vm0, %v845_v19  ;;  %v839_v22 = vld [vmem:[%s1049_s2 + $0x30] sm:$0xff]  }
   0xa   :  { %168 = vrot.lane.b32.xlu0 %v827_v4, %s855_s9  ;;  %170 = vrot.lane.b32.xlu1 %v828_v5, %s855_s9  ;;  %103 = vst.msk [vmem:[#allocation2 + $0x38] sm:$0xff] %vm95_vm0, %v846_v20  ;;  %v840_v23 = vld [vmem:[%s1049_s2 + $0x38] sm:$0xff]   ;;  %v847_v24 = vld [vmem:[%s1051_s4] sm:$0xff]  }
   0xb   :  { %740 = vmatprep.subr.bf16.mxu1 %v833_v10  ;;  %v848_v33 = vld [vmem:[%s1051_s4 + $0x8] sm:$0xff]   ;;  %v849_v37 = vld [vmem:[%s1051_s4 + $0x10] sm:$0xff]   ;;  %v850_v40 = vld [vmem:[%s1051_s4 + $0x18] sm:$0xff]  }
   0xc   :  { %v851_v41 = vld [vmem:[%s1051_s4 + $0x20] sm:$0xff]   ;;  %v852_v44 = vld [vmem:[%s1051_s4 + $0x28] sm:$0xff]   ;;  %v853_v46 = vld [vmem:[%s1051_s4 + $0x30] sm:$0xff]  }
   0xd   :  { %741 = vmatpush3.bf16.msra.mxu1 %v833_v10  ;;  %v854_v47 = vld [vmem:[%s1051_s4 + $0x38] sm:$0xff]   ;;  %v676_v48 = vld [vmem:[%s1052_s3] ss:$0 sm:$0xff] }
   0xe   :  { %172 = vrot.lane.b32.xlu0 %v829_v8, %s855_s9  ;;  %174 = vrot.lane.b32.xlu1 %v830_v9, %s855_s9 }
   0xf   :  { %742 = vmatprep.subr.bf16.mxu1 %v834_v13 }
  0x11   :  { %743 = vmatpush3.bf16.msra.mxu1 %v834_v13 }
  0x12   :  { %744 = vmatprep.subr.bf16.mxu1 %v835_v14 }
  0x15   :  { %745 = vmatpush3.bf16.msra.mxu1 %v835_v14 }
  0x16   :  { %746 = vmatprep.subr.bf16.mxu1 %v837_v21 }
  0x19   :  { %747 = vmatpush3.bf16.msra.mxu1 %v837_v21 }
  0x1a   :  { %748 = vmatprep.subr.bf16.mxu1 %v839_v22 }
  0x1d   :  { %749 = vmatpush3.bf16.msra.mxu1 %v839_v22 }
  0x1e   :  { %750 = vmatprep.subr.bf16.mxu1 %v840_v23 }
  0x21   :  { %751 = vmatpush3.bf16.msra.mxu1 %v840_v23 }
  0x22   :  { %768 = vmatprep.subr.bf16.mxu1 %v847_v24 }
  0x74   :  { %v161_v25 = vpop.permute.xlu0 %160  ;;  %v165_v26 = vpop.permute.xlu1 %164 }
  0x75   :  { %185 = vst.msk [vmem:[#allocation2] sm:$0xff] %vm184_vm1, %v161_v25  ;;  %187 = vst.msk [vmem:[#allocation2 + $0x10] sm:$0xff] %vm184_vm1, %v165_v26 }
  0x78   :  { %v163_v27 = vpop.permute.xlu0 %162  ;;  %v167_v28 = vpop.permute.xlu1 %166 }
  0x79   :  { %186 = vst.msk [vmem:[#allocation2 + $0x8] sm:$0xff] %vm184_vm1, %v163_v27  ;;  %188 = vst.msk [vmem:[#allocation2 + $0x18] sm:$0xff] %vm184_vm1, %v167_v28 }
  0x7c   :  { %v193_v29 = vld [vmem:[#allocation2] sm:$0xff]  ;;  %v169_v30 = vpop.permute.xlu0 %168  ;;  %v171_v31 = vpop.permute.xlu1 %170  ;;  %v195_v32 = vld [vmem:[#allocation2 + $0x10] sm:$0xff] }
  0x7d   :  { %752 = vmatprep.mubr.bf16.mxu1 %v193_v29  ;;  %189 = vst.msk [vmem:[#allocation2 + $0x20] sm:$0xff] %vm184_vm1, %v169_v30  ;;  %190 = vst.msk [vmem:[#allocation2 + $0x28] sm:$0xff] %vm184_vm1, %v171_v31 }
  0x80   :  { %v194_v34 = vld [vmem:[#allocation2 + $0x8] sm:$0xff]  ;;  %v173_v35 = vpop.permute.xlu0 %172  ;;  %v175_v36 = vpop.permute.xlu1 %174  ;;  %v196_v38 = vld [vmem:[#allocation2 + $0x18] sm:$0xff] }
  0x81   :  { %753 = vmatmul.mubr.bf16.vlgmr.msra.gmra.mrb[0].mxu1 %v194_v34  ;;  %191 = vst.msk [vmem:[#allocation2 + $0x30] sm:$0xff] %vm184_vm1, %v173_v35  ;;  %192 = vst.msk [vmem:[#allocation2 + $0x38] sm:$0xff] %vm184_vm1, %v175_v36 }
  0x82   :  { %756 = vmatprep.mubr.bf16.mxu1 %v195_v32  ;;  %769 = vmatpush3.bf16.msra.mxu1 %v847_v24 }
  0x83   :  { %770 = vmatprep.subr.bf16.mxu1 %v848_v33 }
  0x84   :  { %v197_v39 = vld [vmem:[#allocation2 + $0x20] sm:$0xff]  ;;  %v198_v42 = vld [vmem:[#allocation2 + $0x28] sm:$0xff] }
  0x86   :  { %771 = vmatpush3.bf16.msra.mxu1 %v848_v33 }
  0x87   :  { %772 = vmatprep.subr.bf16.mxu1 %v849_v37 }
  0x88   :  { %v199_v43 = vld [vmem:[#allocation2 + $0x30] sm:$0xff]  ;;  %v200_v45 = vld [vmem:[#allocation2 + $0x38] sm:$0xff] }
  0x89   :  { %757 = vmatmul.mubr.bf16.gmra.mrb[4].mxu1 %v196_v38 }
  0x8a   :  { %760 = vmatprep.mubr.bf16.mxu1 %v197_v39  ;;  %773 = vmatpush3.bf16.msra.mxu1 %v849_v37 }
  0x8b   :  { %774 = vmatprep.subr.bf16.mxu1 %v850_v40 }
  0x8e   :  { %775 = vmatpush3.bf16.msra.mxu1 %v850_v40 }
  0x8f   :  { %776 = vmatprep.subr.bf16.mxu1 %v851_v41 }
  0x91   :  { %761 = vmatmul.mubr.bf16.gmra.mrb[8].mxu1 %v198_v42  ;;  %v685_v42 = vld [vmem:[%s1053_s5] ss:$0 sm:$0xff] }
  0x92   :  { %764 = vmatprep.mubr.bf16.mxu1 %v199_v43  ;;  %777 = vmatpush3.bf16.msra.mxu1 %v851_v41  ;;  %v856_v41 = vmov 0.0  }
  0x93   :  { %778 = vmatprep.subr.bf16.mxu1 %v852_v44  ;;  %800 = vmatprep.subr.bf16.mxu0 %v856_v41 }
  0x94   :  { %816 = vmatprep.mubr.msk.bf16.mxu0 %vm857_vm2, %v856_v41 }
  0x96   :  { %779 = vmatpush3.bf16.msra.mxu1 %v852_v44 }
  0x97   :  { %780 = vmatprep.subr.bf16.mxu1 %v853_v46 }
  0x99   :  { %765 = vmatmul.mubr.bf16.gmra.mrb[12].mxu1 %v200_v45 }
  0x9a   :  { %781 = vmatpush3.bf16.msra.mxu1 %v853_v46 }
  0x9b   :  { %782 = vmatprep.subr.bf16.mxu1 %v854_v47 }
  0x9e   :  { %783 = vmatpush3.bf16.msra.mxu1 %v854_v47 }
 0x154   :  { %v754_v49 = vpop.f32.mrb[0].mxu1 }
 0x155   :  { %v315_v50 = vadd.f32 %v754_v49, %v676_v48  ;;  %v306_v51 = vpop.f32.mrb[1].mxu1 }
 0x156   :  { %v307_v52 = vadd.f32 %v676_v48, %v306_v51  ;;  %v755_v53 = vpop.f32.mrb[2].mxu1 }
 0x157   :  { %v318_v54 = vadd.f32 %v755_v53, %v676_v48  ;;  %v309_v55 = vpop.f32.mrb[3].mxu1  ;;  %v371_v57 = vmax.f32 %v315_v50, 0.0 }
 0x158   :  { %v310_v56 = vadd.f32 %v676_v48, %v309_v55  ;;  %v369_v59 = vmax.f32 %v307_v52, 0.0 }
 0x159   :  { %v372_v58 = vmax.f32 %v318_v54, 0.0 }
 0x15a   :  { %v370_v60 = vmax.f32 %v310_v56, 0.0 }
 0x15b   :  { %v386_v61 = vpack.c.bf16 %v372_v58, %v371_v57 }
 0x15c   :  { %v385_v62 = vpack.c.bf16 %v370_v60, %v369_v59  ;;  %v758_v63 = vpop.f32.mrb[4].mxu1 }
 0x15d   :  { %v331_v0 = vadd.f32 %v758_v63, %v676_v48  ;;  %v322_v1 = vpop.f32.mrb[5].mxu1 }
 0x15e   :  { %v323_v2 = vadd.f32 %v676_v48, %v322_v1  ;;  %784 = vmatprep.mubr.bf16.mxu1 %v385_v62  ;;  %v759_v3 = vpop.f32.mrb[6].mxu1 }
 0x15f   :  { %v375_v4 = vmax.f32 %v331_v0, 0.0  ;;  %v334_v5 = vadd.f32 %v759_v3, %v676_v48  ;;  %785 = vmatmul.mubr.bf16.vlgmr.msra.gmra.mrb[16].mxu1 %v386_v61  ;;  %v325_v6 = vpop.f32.mrb[7].mxu1 }
 0x160   :  { %v373_v7 = vmax.f32 %v323_v2, 0.0  ;;  %v326_v8 = vadd.f32 %v676_v48, %v325_v6 }
 0x161   :  { %v376_v9 = vmax.f32 %v334_v5, 0.0 }
 0x162   :  { %v374_v10 = vmax.f32 %v326_v8, 0.0 }
 0x163   :  { %v388_v11 = vpack.c.bf16 %v376_v9, %v375_v4 }
 0x164   :  { %v387_v12 = vpack.c.bf16 %v374_v10, %v373_v7  ;;  %v762_v13 = vpop.f32.mrb[8].mxu1 }
 0x165   :  { %v347_v14 = vadd.f32 %v762_v13, %v676_v48  ;;  %v338_v15 = vpop.f32.mrb[9].mxu1 }
 0x166   :  { %788 = vmatprep.mubr.bf16.mxu1 %v387_v12  ;;  %v339_v16 = vadd.f32 %v676_v48, %v338_v15  ;;  %v763_v17 = vpop.f32.mrb[10].mxu1 }
 0x167   :  { %789 = vmatmul.mubr.bf16.gmra.mrb[20].mxu1 %v388_v11  ;;  %v379_v18 = vmax.f32 %v347_v14, 0.0  ;;  %v350_v19 = vadd.f32 %v763_v17, %v676_v48  ;;  %v341_v20 = vpop.f32.mrb[11].mxu1 }
 0x168   :  { %v377_v21 = vmax.f32 %v339_v16, 0.0  ;;  %v342_v22 = vadd.f32 %v676_v48, %v341_v20 }
 0x169   :  { %v380_v23 = vmax.f32 %v350_v19, 0.0 }
 0x16a   :  { %v378_v24 = vmax.f32 %v342_v22, 0.0 }
 0x16b   :  { %v390_v25 = vpack.c.bf16 %v380_v23, %v379_v18 }
 0x16c   :  { %v389_v26 = vpack.c.bf16 %v378_v24, %v377_v21  ;;  %v766_v27 = vpop.f32.mrb[12].mxu1 }
 0x16d   :  { %v363_v28 = vadd.f32 %v766_v27, %v676_v48  ;;  %v354_v29 = vpop.f32.mrb[13].mxu1 }
 0x16e   :  { %792 = vmatprep.mubr.bf16.mxu1 %v389_v26  ;;  %v355_v30 = vadd.f32 %v676_v48, %v354_v29  ;;  %v767_v31 = vpop.f32.mrb[14].mxu1 }
 0x16f   :  { %793 = vmatmul.mubr.bf16.gmra.mrb[24].mxu1 %v390_v25  ;;  %v383_v32 = vmax.f32 %v363_v28, 0.0  ;;  %v366_v33 = vadd.f32 %v767_v31, %v676_v48  ;;  %v357_v34 = vpop.f32.mrb[15].mxu1 }
 0x170   :  { %v381_v35 = vmax.f32 %v355_v30, 0.0  ;;  %v358_v36 = vadd.f32 %v676_v48, %v357_v34 }
 0x171   :  { %v384_v37 = vmax.f32 %v366_v33, 0.0 }
 0x172   :  { %v382_v38 = vmax.f32 %v358_v36, 0.0 }
 0x173   :  { %v392_v39 = vpack.c.bf16 %v384_v37, %v383_v32 }
 0x174   :  { %v391_v40 = vpack.c.bf16 %v382_v38, %v381_v35 }
 0x176   :  { %796 = vmatprep.mubr.bf16.mxu1 %v391_v40 }
 0x177   :  { %797 = vmatmul.mubr.bf16.gmra.mrb[28].mxu1 %v392_v39 }
 0x232   :  { %v786_v43 = vpop.f32.mrb[16].mxu1 }
 0x233   :  { %v507_v44 = vadd.f32 %v786_v43, %v685_v42  ;;  %v498_v45 = vpop.f32.mrb[17].mxu1 }
 0x234   :  { %v499_v46 = vadd.f32 %v685_v42, %v498_v45  ;;  %v787_v47 = vpop.f32.mrb[18].mxu1  ;;  %v587_v45 = vstv %s1055_s7 }
 0x235   :  { %v510_v48 = vadd.f32 %v787_v47, %v685_v42  ;;  %v501_v49 = vpop.f32.mrb[19].mxu1  ;;  %v563_v51 = vmax.f32 %v507_v44, 0.0  ;;  %v577_v44 = vld [vmem:[%s1054_s6] sm:$0x1] }
 0x236   :  { %v502_v50 = vadd.f32 %v685_v42, %v501_v49  ;;  %v561_v53 = vmax.f32 %v499_v46, 0.0 }
 0x237   :  { %v564_v52 = vmax.f32 %v510_v48, 0.0 }
 0x238   :  { %v562_v54 = vmax.f32 %v502_v50, 0.0 }
 0x239   :  { %v579_v55 = vpack.c.bf16 %v564_v52, %v563_v51 }
 0x23a   :  { %v790_v56 = vpop.f32.mrb[20].mxu1  ;;  %v578_v57 = vpack.c.bf16 %v562_v54, %v561_v53 }
 0x23b   :  { %v523_v58 = vadd.f32 %v790_v56, %v685_v42  ;;  %v514_v59 = vpop.f32.mrb[21].mxu1  ;;  %v595_v11 = vsel %vm95_vm0, %v579_v55, 0 }
 0x23c   :  { %v515_v60 = vadd.f32 %v685_v42, %v514_v59  ;;  %v791_v61 = vpop.f32.mrb[22].mxu1  ;;  %v592_v62 = vsel %vm95_vm0, %v578_v57, 0 }
 0x23d   :  { %v567_v63 = vmax.f32 %v523_v58, 0.0  ;;  %v526_v0 = vadd.f32 %v791_v61, %v685_v42  ;;  %801 = vmatpush3.bf16.xpose.msra.mxu0 %v592_v62  ;;  %v517_v1 = vpop.f32.mrb[23].mxu1 }
 0x23e   :  { %v565_v2 = vmax.f32 %v515_v60, 0.0  ;;  %v518_v3 = vadd.f32 %v685_v42, %v517_v1  ;;  %802 = vmatprep.subr.bf16.mxu0 %v856_v41 }
 0x23f   :  { %v568_v4 = vmax.f32 %v526_v0, 0.0 }
 0x240   :  { %v566_v5 = vmax.f32 %v518_v3, 0.0 }
 0x241   :  { %v581_v6 = vpack.c.bf16 %v568_v4, %v567_v63 }
 0x242   :  { %v580_v7 = vpack.c.bf16 %v566_v5, %v565_v2  ;;  %v794_v8 = vpop.f32.mrb[24].mxu1 }
 0x243   :  { %v539_v9 = vadd.f32 %v794_v8, %v685_v42  ;;  %v530_v10 = vpop.f32.mrb[25].mxu1  ;;  %v601_v38 = vsel %vm95_vm0, %v581_v6, 0 }
 0x244   :  { %v531_v12 = vadd.f32 %v685_v42, %v530_v10  ;;  %v795_v13 = vpop.f32.mrb[26].mxu1  ;;  %v598_v26 = vsel %vm95_vm0, %v580_v7, 0 }
 0x245   :  { %803 = vmatpush3.bf16.xpose.msra.mxu0 %v595_v11  ;;  %v571_v14 = vmax.f32 %v539_v9, 0.0  ;;  %v542_v15 = vadd.f32 %v795_v13, %v685_v42  ;;  %v533_v16 = vpop.f32.mrb[27].mxu1 }
 0x246   :  { %v569_v17 = vmax.f32 %v531_v12, 0.0  ;;  %804 = vmatprep.subr.bf16.mxu0 %v856_v41  ;;  %v534_v18 = vadd.f32 %v685_v42, %v533_v16 }
 0x247   :  { %v572_v19 = vmax.f32 %v542_v15, 0.0 }
 0x248   :  { %v570_v20 = vmax.f32 %v534_v18, 0.0 }
 0x249   :  { %v583_v21 = vpack.c.bf16 %v572_v19, %v571_v14 }
 0x24a   :  { %v582_v22 = vpack.c.bf16 %v570_v20, %v569_v17  ;;  %v798_v23 = vpop.f32.mrb[28].mxu1 }
 0x24b   :  { %v555_v24 = vadd.f32 %v798_v23, %v685_v42  ;;  %v546_v25 = vpop.f32.mrb[29].mxu1  ;;  %v607_v40 = vsel %vm95_vm0, %v583_v21, 0 }
 0x24c   :  { %v547_v27 = vadd.f32 %v685_v42, %v546_v25  ;;  %v799_v28 = vpop.f32.mrb[30].mxu1  ;;  %v604_v39 = vsel %vm95_vm0, %v582_v22, 0 }
 0x24d   :  { %805 = vmatpush3.bf16.xpose.msra.mxu0 %v598_v26  ;;  %v575_v29 = vmax.f32 %v555_v24, 0.0  ;;  %v558_v30 = vadd.f32 %v799_v28, %v685_v42  ;;  %v549_v31 = vpop.f32.mrb[31].mxu1 }
 0x24e   :  { %806 = vmatprep.subr.bf16.mxu0 %v856_v41  ;;  %v573_v32 = vmax.f32 %v547_v27, 0.0  ;;  %v550_v33 = vadd.f32 %v685_v42, %v549_v31 }
 0x24f   :  { %v576_v34 = vmax.f32 %v558_v30, 0.0 }
 0x250   :  { %v574_v35 = vmax.f32 %v550_v33, 0.0 }
 0x251   :  { %v585_v36 = vpack.c.bf16 %v576_v34, %v575_v29 }
 0x252   :  { %v584_v37 = vpack.c.bf16 %v574_v35, %v573_v32 }
 0x253   :  { %v613_v43 = vsel %vm95_vm0, %v585_v36, 0 }
 0x254   :  { %v610_v42 = vsel %vm95_vm0, %v584_v37, 0 }
 0x255   :  { %807 = vmatpush3.bf16.xpose.msra.mxu0 %v601_v38 }
 0x256   :  { %808 = vmatprep.subr.bf16.mxu0 %v856_v41 }
 0x25d   :  { %809 = vmatpush3.bf16.xpose.msra.mxu0 %v604_v39 }
 0x25e   :  { %810 = vmatprep.subr.bf16.mxu0 %v856_v41 }
 0x265   :  { %811 = vmatpush3.bf16.xpose.msra.mxu0 %v607_v40 }
 0x266   :  { %812 = vmatprep.subr.bf16.mxu0 %v856_v41 }
 0x26d   :  { %813 = vmatpush3.bf16.xpose.msra.mxu0 %v610_v42 }
 0x26e   :  { %814 = vmatprep.subr.bf16.mxu0 %v856_v41 }
 0x275   :  { %815 = vmatpush3.bf16.xpose.msra.mxu0 %v613_v43 }
 0x27c   :  { %817 = vmatmul.mubr.msk.bf16.vlgmr.msra.gmra.mrb[0].mxu0 %vm95_vm0, %v577_v44 }
 0x34f   :  { %v649_v46 = vpop.f32.mrb[0].mxu0 }
 0x350   :  { %v650_v47 = vadd.f32 %v649_v46, %v587_v45  ;;  %v818_v48 = vpop.f32.mrb[1].mxu0 }
 0x351   :  { %v652_v49 = vpop.f32.mrb[2].mxu0 }
 0x352   :  { %655 = vst [vmem:[%s1056_s8] sm:$0x1] %v650_v47  ;;  %v819_v41 = vpop.f32.mrb[3].mxu0 }

</bundles_post_ra>
